<compile_context>
chip_gen: v7x
topology: tpu7x:2x2x1
jax: 0.10.0
libtpu: 0.0.40
codegen_flags: <defaults>
</compile_context>

<pallas_src>
import functools

import jax
import jax.numpy as jnp
import numpy as np
from jax import lax
from jax.experimental import pallas as pl
from jax.experimental.pallas import tpu as pltpu


# -----------------------------------------------------------------------------
# Fused LSA kernel: one grid step = one batch block (Bblk batch elements).
# Inputs (VMEM):
#   x_ref      : (Bblk*N, D)        flattened tokens for this batch block (compute_dtype)
#   wqkv_ref   : (3*inner, D)       packed [Wq*exp(T); Wk; Wv]             (compute_dtype)
#   wout_t_ref : (inner, D)         W_out^T                                 (compute_dtype)
#   bout_ref   : (1, D)             output bias (f32)
#   o_ref      : (Bblk*N, D)        output tokens (original input dtype)
# Scratch (VMEM):
#   qkvt_ref   : (3*inner, Bblk*N)  qkv^T staging (compute_dtype)
#   oslab_ref  : (inner, Bblk*N)    per-head attention outputs, transposed (compute_dtype)
# -----------------------------------------------------------------------------
def _lsa_fused_kernel(x_ref, wqkv_ref, wout_t_ref, bout_ref, o_ref,
                      qkvt_ref, oslab_ref, *,
                      bblk, seq, heads, dim_head, compute_dtype):
    inner = heads * dim_head

    # --- Stage 1: packed QKV projection for the whole batch block (transposed form) ---
    # qkvT[r, m] = sum_d W_qkv[r, d] * x_flat[m, d]   -> (3*inner, Bblk*N)
    # exp(temperature) was folded into the q rows of W_qkv by the wrapper.
    qkvt_ref[...] = lax.dot_general(
        wqkv_ref[...], x_ref[...], (((1,), (1,)), ((), ())),
        preferred_element_type=jnp.float32).astype(compute_dtype)

    # Diagonal (self-token) mask, built once and shared by every (batch, head) pair.
    row = lax.broadcasted_iota(jnp.int32, (seq, seq), 0)
    col = lax.broadcasted_iota(jnp.int32, (seq, seq), 1)
    diag = row == col
    mask_value = jnp.float32(-1e30)  # large finite: exp() -> 0 exactly, no -inf intermediates

    # --- Stage 2: per-(batch, head) attention -----------------------------------------
    # Batch loop is static Python (lane offsets b*N are compile-time constants); the head
    # loop is a fori_loop so only ONE head's (N, N) temporaries are live at a time.
    for b in range(bblk):
        col_lo = b * seq

        def head_body(h, carry, _col_lo=col_lo):
            base = pl.multiple_of(h * dim_head, dim_head)    # sublane-aligned row start
            cols = pl.ds(_col_lo, seq)
            q_t = qkvt_ref[pl.ds(base, dim_head), cols]                 # (Dh, N)
            k_t = qkvt_ref[pl.ds(inner + base, dim_head), cols]        # (Dh, N)
            v_t = qkvt_ref[pl.ds(2 * inner + base, dim_head), cols]    # (Dh, N)

            # dots = q @ k^T : contract the (sublane) head dim of both -> (N, N) f32.
            dots = lax.dot_general(q_t, k_t, (((0,), (0,)), ((), ())),
                                   preferred_element_type=jnp.float32)
            dots = jnp.where(diag, mask_value, dots)
            dots = dots - jnp.max(dots, axis=-1, keepdims=True)
            e = jnp.exp(dots)
            attn = e * pl.reciprocal(jnp.sum(e, axis=-1, keepdims=True), approx=True)

            # o_h^T = (attn @ v)^T -> (Dh, N); staged transposed so the write is a
            # sublane-aligned slab slice feeding the fused output projection.
            o_t = lax.dot_general(v_t, attn.astype(compute_dtype),
                                  (((1,), (1,)), ((), ())),
                                  preferred_element_type=jnp.float32)
            oslab_ref[pl.ds(base, dim_head), cols] = o_t.astype(compute_dtype)
            return carry

        lax.fori_loop(0, heads, head_body, 0)

    # --- Stage 3: fused output projection + bias, one matmul over the whole block -----
    # y[m, c] = sum_f out[m, f] * W_out[c, f]   (contraction dim = inner, not 16)
    y = lax.dot_general(oslab_ref[...], wout_t_ref[...], (((0,), (0,)), ((), ())),
                        preferred_element_type=jnp.float32)        # (Bblk*N, D) f32
    o_ref[...] = (y + bout_ref[...]).astype(o_ref.dtype)           # Dropout(0.0) == identity


# -----------------------------------------------------------------------------
# Wrapper: single pallas_call, grid over batch blocks only.
# -----------------------------------------------------------------------------
def lsa_forward(x, params, heads, dim_head, *, bblk=None, compute_dtype=jnp.bfloat16):
    B, N, D = x.shape
    inner = heads * dim_head

    # Pick a batch block: amortize grid overhead / fatten DMA tiles while keeping the
    # (Bblk*N, D) block sublane-legal (Bblk*N % 8 == 0 or the full array).
    # TODO(synk): at realistic sizes, size Bblk against v7x's 64 MiB VMEM (roughly half the
    #             v5e/v6e tile) and prefer Bblk*N / D multiples of 128 on v5e.
    if bblk is None:
        for cand in (8, 4, 2, 1):
            if B % cand == 0 and (cand * N) % 8 == 0:
                bblk = cand
                break
        else:
            bblk = B
    assert B % bblk == 0

    # One-time weight transforms (outside the hot path):
    #  * fold exp(temperature) into the q rows of the packed QKV weight,
    #  * present W_out as W_out^T so its inner-feature rows match the slab's sublane rows,
    #  * cast MXU operands to compute_dtype (halves weight/x HBM bytes for bf16).
    scale = jnp.exp(params["temperature"]).astype(jnp.float32)
    w_qkv = params["w_qkv"].astype(jnp.float32)
    w_qkv = w_qkv.at[:inner].multiply(scale).astype(compute_dtype)       # (3*inner, D)
    w_out_t = jnp.transpose(params["w_out"]).astype(compute_dtype)       # (inner, D)
    b_out = params["b_out"].reshape(1, D).astype(jnp.float32)

    x_flat = x.reshape(B * N, D).astype(compute_dtype)                   # (B*N, D)

    kernel = functools.partial(_lsa_fused_kernel, bblk=bblk, seq=N,
                               heads=heads, dim_head=dim_head,
                               compute_dtype=compute_dtype)

    tok = bblk * N
    grid_spec = pltpu.PrefetchScalarGridSpec(
        num_scalar_prefetch=0,
        grid=(B // bblk,),
        in_specs=[
            pl.BlockSpec((tok, D), lambda i: (i, 0)),        # x block (Bblk*N, D)
            # Weights/bias: constant index_map -> VMEM-resident, DMA'd once.
            # TODO(synk): mark these pipeline_mode=pl.Buffered(1) to drop the second,
            #             never-refilled pipeline buffer once tiles grow (matters most
            #             under v7x's 64 MiB VMEM budget).
            pl.BlockSpec((3 * inner, D), lambda i: (0, 0)),
            pl.BlockSpec((inner, D), lambda i: (0, 0)),
            pl.BlockSpec((1, D), lambda i: (0, 0)),
        ],
        out_specs=pl.BlockSpec((tok, D), lambda i: (i, 0)),
        scratch_shapes=[
            pltpu.VMEM((3 * inner, tok), compute_dtype),     # qkv^T staging
            pltpu.VMEM((inner, tok), compute_dtype),         # transposed head outputs
        ],
    )

    out_flat = pl.pallas_call(
        kernel,
        out_shape=jax.ShapeDtypeStruct((B * N, D), x.dtype),
        grid_spec=grid_spec,
        compiler_params=pltpu.CompilerParams(
            # Batch-block axis is independent work.
            # TODO(synk): on v7x switch this axis to pltpu.CORE_PARALLEL (or split B via
            #             pltpu.create_tensorcore_mesh + pl.core_map) so both TensorCores
            #             actually share the batch axis.
            dimension_semantics=("parallel",),
            vmem_limit_bytes=32 * 1024 * 1024,
        ),
    )(x_flat, w_qkv, w_out_t, b_out)

    return out_flat.reshape(B, N, D)


# -----------------------------------------------------------------------------
# Pure-JAX reference for verification (exact f32, mirrors the PyTorch module)
# -----------------------------------------------------------------------------
def lsa_reference(x, params, heads, dim_head):
    B, N, D = x.shape
    inner = heads * dim_head
    qkv = jnp.einsum("bnd,fd->bnf", x, params["w_qkv"])
    q, k, v = jnp.split(qkv, 3, axis=-1)
    q, k, v = (t.reshape(B, N, heads, dim_head).transpose(0, 2, 1, 3)
               for t in (q, k, v))
    dots = jnp.einsum("bhnd,bhmd->bhnm", q, k) * jnp.exp(params["temperature"])
    eye = jnp.eye(N, dtype=bool)
    dots = jnp.where(eye[None, None], -jnp.finfo(jnp.float32).max, dots)
    attn = jax.nn.softmax(dots, axis=-1)
    out = jnp.einsum("bhnm,bhmd->bhnd", attn, v)
    out = out.transpose(0, 2, 1, 3).reshape(B, N, inner)
    return jnp.einsum("bnf,df->bnd", out, params["w_out"]) + params["b_out"]


if __name__ == "__main__":
    # Small shapes consistent with the module's forward: x of shape (b, n, dim).
    B, N, dim = 2, 8, 32
    heads, dim_head = 4, 16
    inner = heads * dim_head

    key = jax.random.PRNGKey(0)
    kx, kq, ko, kb = jax.random.split(key, 4)

    x = jax.random.normal(kx, (B, N, dim), dtype=jnp.float32)

    # Deterministic parameter init (TicketLinear treated as a dense Linear).
    params = {
        "w_qkv": 0.1 * jax.random.normal(kq, (3 * inner, dim), dtype=jnp.float32),
        "w_out": 0.1 * jax.random.normal(ko, (dim, inner), dtype=jnp.float32),
        "b_out": 0.05 * jax.random.normal(kb, (dim,), dtype=jnp.float32),
        # nn.Parameter(log(dim_head**-0.5))
        "temperature": jnp.log(jnp.asarray(dim_head, jnp.float32) ** -0.5),
    }

    ref = lsa_reference(x, params, heads, dim_head)

    # 1) Exact-f32 compute path: tight correctness check (only the approx EUP reciprocal
    #    used for the softmax denominator differs from the pure-JAX reference).
    out_f32 = jax.block_until_ready(
        lsa_forward(x, params, heads, dim_head, compute_dtype=jnp.float32))
    assert out_f32.shape == (B, N, dim)
    np.testing.assert_allclose(np.asarray(out_f32), np.asarray(ref), rtol=2e-3, atol=2e-3)

    # 2) bf16-MXU production path (f32 accumulation): looser tolerance covers bf16 operand
    #    rounding; errors are far below this bound while real bugs are far above it.
    out_bf16 = jax.block_until_ready(
        lsa_forward(x, params, heads, dim_head, compute_dtype=jnp.bfloat16))
    np.testing.assert_allclose(np.asarray(out_bf16), np.asarray(ref), rtol=3e-2, atol=3e-2)

    print("KERNEL_OK")
</pallas_src>

<mosaic_0001>
module attributes {stable_mosaic.version = 11 : i64} {
  func.func @_lsa_fused_kernel(%arg0: i32, %arg1: memref<16x32xf32, #tpu.memory_space<vmem>>, %arg2: memref<192x32xf32, #tpu.memory_space<vmem>>, %arg3: memref<64x32xf32, #tpu.memory_space<vmem>>, %arg4: memref<1x32xf32, #tpu.memory_space<vmem>>, %arg5: memref<16x32xf32, #tpu.memory_space<vmem>>, %arg6: memref<192x16xf32, #tpu.memory_space<vmem>>, %arg7: memref<64x16xf32, #tpu.memory_space<vmem>>) attributes {dimension_semantics = [#tpu.dimension_semantics<parallel>], iteration_bounds = array<i64: 1>, scalar_prefetch = 0 : i64, scratch_operands = 2 : i64, tpu.core_type = #tpu.core_type<tc>, window_params = [{transform_indices = @transform_0, window_bounds = array<i64: 16, 32>}, {pipeline_mode = #tpu.pipeline_mode<synchronous>, transform_indices = @transform_1, window_bounds = array<i64: 192, 32>}, {pipeline_mode = #tpu.pipeline_mode<synchronous>, transform_indices = @transform_2, window_bounds = array<i64: 64, 32>}, {pipeline_mode = #tpu.pipeline_mode<synchronous>, transform_indices = @transform_3, window_bounds = array<i64: 1, 32>}, {transform_indices = @transform_4, window_bounds = array<i64: 16, 32>}]} {
    %c0 = arith.constant 0 : index
    %c0_0 = arith.constant 0 : index
    %0 = vector.load %arg2[%c0, %c0_0] : memref<192x32xf32, #tpu.memory_space<vmem>>, vector<192x32xf32>
    %c0_1 = arith.constant 0 : index
    %c0_2 = arith.constant 0 : index
    %1 = vector.load %arg1[%c0_1, %c0_2] : memref<16x32xf32, #tpu.memory_space<vmem>>, vector<16x32xf32>
    %cst = arith.constant dense<0.000000e+00> : vector<192x16xf32>
    %2 = tpu.matmul %0, %1, %cst {dimension_numbers = #tpu.dot_dimension_numbers<[1], [1], [0], [0], [0, 0, 1, 0], [], []>} : vector<192x32xf32>, vector<16x32xf32>, vector<192x16xf32> -> vector<192x16xf32>
    %c0_3 = arith.constant 0 : index
    %c0_4 = arith.constant 0 : index
    %3 = vector.load %arg6[%c0_3, %c0_4] : memref<192x16xf32, #tpu.memory_space<vmem>>, vector<192x16xf32>
    tpu.vector_store %arg6[%c0_3, %c0_4], %2 {strides = array<i32>} : memref<192x16xf32, #tpu.memory_space<vmem>>, vector<192x16xf32>,
    %4 = tpu.iota {dimensions = array<i32: 0>} : vector<8x8xi32>
    %5 = tpu.iota {dimensions = array<i32: 1>} : vector<8x8xi32>
    %6 = arith.cmpi eq, %4, %5 : vector<8x8xi32>
    %cst_5 = arith.constant -1.000000e+30 : f32
    %c0_i32 = arith.constant 0 : i32
    %c4_i32 = arith.constant 4 : i32
    %7 = arith.addi %c0_i32, %c4_i32 : i32
    %c1_i32 = arith.constant 1 : i32
    scf.for %arg8 = %c0_i32 to %7 step %c1_i32  : i32 {
      %c16_i32 = arith.constant 16 : i32
      %16 = arith.muli %arg8, %c16_i32 : i32
      %17 = tpu.assume_multiple %16, 16 : i32
      %18 = arith.index_cast %17 : i32 to index
      %c0_21 = arith.constant 0 : index
      %19 = vector.load %arg6[%18, %c0_21] : memref<192x16xf32, #tpu.memory_space<vmem>>, vector<16x8xf32>
      %c64_i32 = arith.constant 64 : i32
      %20 = arith.addi %c64_i32, %17 : i32
      %21 = arith.index_cast %20 : i32 to index
      %c0_22 = arith.constant 0 : index
      %22 = vector.load %arg6[%21, %c0_22] : memref<192x16xf32, #tpu.memory_space<vmem>>, vector<16x8xf32>
      %c128_i32 = arith.constant 128 : i32
      %23 = arith.addi %c128_i32, %17 : i32
      %24 = arith.index_cast %23 : i32 to index
      %c0_23 = arith.constant 0 : index
      %25 = vector.load %arg6[%24, %c0_23] : memref<192x16xf32, #tpu.memory_space<vmem>>, vector<16x8xf32>
      %cst_24 = arith.constant dense<0.000000e+00> : vector<8x8xf32>
      %26 = tpu.matmul %19, %22, %cst_24 {dimension_numbers = #tpu.dot_dimension_numbers<[0], [0], [1], [1], [0, 1, 1, 1], [], []>} : vector<16x8xf32>, vector<16x8xf32>, vector<8x8xf32> -> vector<8x8xf32>
      %27 = vector.broadcast %cst_5 : f32 to vector<8x8xf32>
      %28 = arith.select %6, %27, %26 : vector<8x8xi1>, vector<8x8xf32>
      %cst_25 = arith.constant dense<0xFF800000> : vector<8xf32>
      %29 = vector.multi_reduction <maximumf>, %28, %cst_25 [1] : vector<8x8xf32> to vector<8xf32>
      %30 = vector.shape_cast %29 : vector<8xf32> to vector<8x1xf32>
      %31 = vector.broadcast %30 : vector<8x1xf32> to vector<8x8xf32>
      %32 = arith.subf %28, %31 : vector<8x8xf32>
      %33 = math.exp %32 : vector<8x8xf32>
      %cst_26 = arith.constant dense<0.000000e+00> : vector<8xf32>
      %34 = vector.multi_reduction <add>, %33, %cst_26 [1] : vector<8x8xf32> to vector<8xf32>
      %35 = vector.shape_cast %34 : vector<8xf32> to vector<8x1xf32>
      %36 = tpu.reciprocal %35 {approx = true} : vector<8x1xf32> -> vector<8x1xf32>
      %37 = vector.broadcast %36 : vector<8x1xf32> to vector<8x8xf32>
      %38 = arith.mulf %33, %37 : vector<8x8xf32>
      %cst_27 = arith.constant dense<0.000000e+00> : vector<16x8xf32>
      %39 = tpu.matmul %25, %38, %cst_27 {dimension_numbers = #tpu.dot_dimension_numbers<[1], [1], [0], [0], [0, 0, 1, 0], [], []>} : vector<16x8xf32>, vector<8x8xf32>, vector<16x8xf32> -> vector<16x8xf32>
      %40 = arith.index_cast %17 : i32 to index
      %c0_28 = arith.constant 0 : index
      %41 = vector.load %arg7[%40, %c0_28] : memref<64x16xf32, #tpu.memory_space<vmem>>, vector<16x8xf32>
      tpu.vector_store %arg7[%40, %c0_28], %39 {strides = array<i32>} : memref<64x16xf32, #tpu.memory_space<vmem>>, vector<16x8xf32>,
    }
    %c4_i32_6 = arith.constant 4 : i32
    %cst_7 = arith.constant -1.000000e+30 : f32
    %c0_i32_8 = arith.constant 0 : i32
    %c4_i32_9 = arith.constant 4 : i32
    %8 = arith.addi %c0_i32_8, %c4_i32_9 : i32
    %c1_i32_10 = arith.constant 1 : i32
    scf.for %arg8 = %c0_i32_8 to %8 step %c1_i32_10  : i32 {
      %c16_i32 = arith.constant 16 : i32
      %16 = arith.muli %arg8, %c16_i32 : i32
      %17 = tpu.assume_multiple %16, 16 : i32
      %18 = arith.index_cast %17 : i32 to index
      %c8 = arith.constant 8 : index
      %19 = vector.load %arg6[%18, %c8] : memref<192x16xf32, #tpu.memory_space<vmem>>, vector<16x8xf32>
      %c64_i32 = arith.constant 64 : i32
      %20 = arith.addi %c64_i32, %17 : i32
      %21 = arith.index_cast %20 : i32 to index
      %c8_21 = arith.constant 8 : index
      %22 = vector.load %arg6[%21, %c8_21] : memref<192x16xf32, #tpu.memory_space<vmem>>, vector<16x8xf32>
      %c128_i32 = arith.constant 128 : i32
      %23 = arith.addi %c128_i32, %17 : i32
      %24 = arith.index_cast %23 : i32 to index
      %c8_22 = arith.constant 8 : index
      %25 = vector.load %arg6[%24, %c8_22] : memref<192x16xf32, #tpu.memory_space<vmem>>, vector<16x8xf32>
      %cst_23 = arith.constant dense<0.000000e+00> : vector<8x8xf32>
      %26 = tpu.matmul %19, %22, %cst_23 {dimension_numbers = #tpu.dot_dimension_numbers<[0], [0], [1], [1], [0, 1, 1, 1], [], []>} : vector<16x8xf32>, vector<16x8xf32>, vector<8x8xf32> -> vector<8x8xf32>
      %27 = vector.broadcast %cst_7 : f32 to vector<8x8xf32>
      %28 = arith.select %6, %27, %26 : vector<8x8xi1>, vector<8x8xf32>
      %cst_24 = arith.constant dense<0xFF800000> : vector<8xf32>
      %29 = vector.multi_reduction <maximumf>, %28, %cst_24 [1] : vector<8x8xf32> to vector<8xf32>
      %30 = vector.shape_cast %29 : vector<8xf32> to vector<8x1xf32>
      %31 = vector.broadcast %30 : vector<8x1xf32> to vector<8x8xf32>
      %32 = arith.subf %28, %31 : vector<8x8xf32>
      %33 = math.exp %32 : vector<8x8xf32>
      %cst_25 = arith.constant dense<0.000000e+00> : vector<8xf32>
      %34 = vector.multi_reduction <add>, %33, %cst_25 [1] : vector<8x8xf32> to vector<8xf32>
      %35 = vector.shape_cast %34 : vector<8xf32> to vector<8x1xf32>
      %36 = tpu.reciprocal %35 {approx = true} : vector<8x1xf32> -> vector<8x1xf32>
      %37 = vector.broadcast %36 : vector<8x1xf32> to vector<8x8xf32>
      %38 = arith.mulf %33, %37 : vector<8x8xf32>
      %cst_26 = arith.constant dense<0.000000e+00> : vector<16x8xf32>
      %39 = tpu.matmul %25, %38, %cst_26 {dimension_numbers = #tpu.dot_dimension_numbers<[1], [1], [0], [0], [0, 0, 1, 0], [], []>} : vector<16x8xf32>, vector<8x8xf32>, vector<16x8xf32> -> vector<16x8xf32>
      %40 = arith.index_cast %17 : i32 to index
      %c8_27 = arith.constant 8 : index
      %41 = vector.load %arg7[%40, %c8_27] : memref<64x16xf32, #tpu.memory_space<vmem>>, vector<16x8xf32>
      tpu.vector_store %arg7[%40, %c8_27], %39 {strides = array<i32>} : memref<64x16xf32, #tpu.memory_space<vmem>>, vector<16x8xf32>,
    }
    %c4_i32_11 = arith.constant 4 : i32
    %c0_12 = arith.constant 0 : index
    %c0_13 = arith.constant 0 : index
    %9 = vector.load %arg7[%c0_12, %c0_13] : memref<64x16xf32, #tpu.memory_space<vmem>>, vector<64x16xf32>
    %c0_14 = arith.constant 0 : index
    %c0_15 = arith.constant 0 : index
    %10 = vector.load %arg3[%c0_14, %c0_15] : memref<64x32xf32, #tpu.memory_space<vmem>>, vector<64x32xf32>
    %cst_16 = arith.constant dense<0.000000e+00> : vector<16x32xf32>
    %11 = tpu.matmul %9, %10, %cst_16 {dimension_numbers = #tpu.dot_dimension_numbers<[0], [0], [1], [1], [0, 1, 1, 1], [], []>} : vector<64x16xf32>, vector<64x32xf32>, vector<16x32xf32> -> vector<16x32xf32>
    %c0_17 = arith.constant 0 : index
    %c0_18 = arith.constant 0 : index
    %12 = vector.load %arg4[%c0_17, %c0_18] : memref<1x32xf32, #tpu.memory_space<vmem>>, vector<1x32xf32>
    %13 = vector.broadcast %12 : vector<1x32xf32> to vector<16x32xf32>
    %14 = arith.addf %11, %13 : vector<16x32xf32>
    %c0_19 = arith.constant 0 : index
    %c0_20 = arith.constant 0 : index
    %15 = vector.load %arg5[%c0_19, %c0_20] : memref<16x32xf32, #tpu.memory_space<vmem>>, vector<16x32xf32>
    tpu.vector_store %arg5[%c0_19, %c0_20], %14 {strides = array<i32>} : memref<16x32xf32, #tpu.memory_space<vmem>>, vector<16x32xf32>,
    return
  }
  func.func @transform_0(%arg0: i32) -> (i32, i32) {
    %c0_i32 = arith.constant 0 : i32
    %c0_i32_0 = arith.constant 0 : i32
    return %arg0, %c0_i32 : i32, i32
  }
  func.func @transform_1(%arg0: i32) -> (i32, i32) {
    %c0_i32 = arith.constant 0 : i32
    %c0_i32_0 = arith.constant 0 : i32
    %c0_i32_1 = arith.constant 0 : i32
    return %c0_i32, %c0_i32_0 : i32, i32
  }
  func.func @transform_2(%arg0: i32) -> (i32, i32) {
    %c0_i32 = arith.constant 0 : i32
    %c0_i32_0 = arith.constant 0 : i32
    %c0_i32_1 = arith.constant 0 : i32
    return %c0_i32, %c0_i32_0 : i32, i32
  }
  func.func @transform_3(%arg0: i32) -> (i32, i32) {
    %c0_i32 = arith.constant 0 : i32
    %c0_i32_0 = arith.constant 0 : i32
    %c0_i32_1 = arith.constant 0 : i32
    return %c0_i32, %c0_i32_0 : i32, i32
  }
  func.func @transform_4(%arg0: i32) -> (i32, i32) {
    %c0_i32 = arith.constant 0 : i32
    %c0_i32_0 = arith.constant 0 : i32
    return %arg0, %c0_i32 : i32, i32
  }
}

</mosaic_0001>

<bundles_post_ra>
// kernel: tpu_custom_call.1
= control target key start
LH: loop header
LB: loop body
LE: loop exit
PB: predicated region body
PF: predicated region fallthrough
CT: control target
= control target key end

     0   :  { %9 = vsyncpa [#allocation5], 0  ;;  %vm44_vm0 = vcmask 261120   ;;  %v333_v27 = vlaneseq  ;;  %vm308_vm3 = vcmask 130048   ;;  %s1571_s0 = inlined_call_operand.vmem [shape: f32[16,32], index: 0, kind: input, shape index: {}]   ;;  %s1572_s1 = inlined_call_operand.vmem [shape: f32[192,32], index: 1, kind: input, shape index: {}]   ;;  %s1573_s2 = inlined_call_operand.vmem [shape: f32[64,32], index: 2, kind: input, shape index: {}]   ;;  %s1574_s3 = inlined_call_operand.vmem [shape: f32[1,32], index: 3, kind: input, shape index: {}]   ;;  %s1575_s4 = inlined_call_operand.hbm [shape: f32[16,32], index: 4, kind: output, shape index: {}]  }
   0x1   :  { %v42_v0 = vld [vmem:[%s1571_s0] sm:$0xff]  ;;  %v43_v1 = vld [vmem:[%s1571_s0 + $0x8] sm:$0xff]  ;;  %vm1181_vm1 = vmpackc.low %vm44_vm0, %vm44_vm0 }
   0x2   :  { %v1180_v2 = vpack.c.bf16 %v43_v1, %v42_v0  ;;  %v18_v3 = vld [vmem:[%s1572_s1] sm:$0xff]  ;;  %v19_v5 = vld [vmem:[%s1572_s1 + $0x8] sm:$0xff]  ;;  %v20_v7 = vld [vmem:[%s1572_s1 + $0x10] sm:$0xff]  ;;  %v1431_v28 = vshrl.u32 %v333_v27, 7  ;;  %v1433_v29 = vand.u32 127, %v333_v27 }
   0x3   :  { %v30_v4 = vld [vmem:[%s1572_s1 + $0x60] sm:$0xff]  ;;  %1101 = vmatprep.mubr.msk.f32.mxu0 %vm44_vm0, %v18_v3  ;;  %v31_v6 = vld [vmem:[%s1572_s1 + $0x68] sm:$0xff]  ;;  %v32_v8 = vld [vmem:[%s1572_s1 + $0x70] sm:$0xff] }
   0x4   :  { %1119 = vmatprep.mubr.msk.f32.mxu1 %vm44_vm0, %v30_v4  ;;  %1182 = vmatprep.subr.msk.bf16.mxu0 %vm1181_vm1, %v1180_v2  ;;  %v21_v9 = vld [vmem:[%s1572_s1 + $0x18] sm:$0xff]  ;;  %v22_v11 = vld [vmem:[%s1572_s1 + $0x20] sm:$0xff]  ;;  %v23_v13 = vld [vmem:[%s1572_s1 + $0x28] sm:$0xff]  ;;  %vm337_vm2 = vcmp.eq.s32.totalorder %v1431_v28, %v1433_v29 }
   0x5   :  { %1208 = vmatprep.subr.msk.bf16.mxu1 %vm1181_vm1, %v1180_v2  ;;  %1185 = vmatpush3.bf16.xpose.msk.msra.mxu0 %vm1181_vm1, %v1180_v2  ;;  %v33_v10 = vld [vmem:[%s1572_s1 + $0x78] sm:$0xff]  ;;  %v34_v12 = vld [vmem:[%s1572_s1 + $0x80] sm:$0xff]  ;;  %v35_v14 = vld [vmem:[%s1572_s1 + $0x88] sm:$0xff] }
   0x6   :  { %1209 = vmatpush3.bf16.xpose.msk.msra.mxu1 %vm1181_vm1, %v1180_v2  ;;  %v24_v15 = vld [vmem:[%s1572_s1 + $0x30] sm:$0xff]  ;;  %v25_v17 = vld [vmem:[%s1572_s1 + $0x38] sm:$0xff]  ;;  %v26_v19 = vld [vmem:[%s1572_s1 + $0x40] sm:$0xff] }
   0x7   :  { %v36_v16 = vld [vmem:[%s1572_s1 + $0x90] sm:$0xff]  ;;  %v37_v18 = vld [vmem:[%s1572_s1 + $0x98] sm:$0xff]  ;;  %v38_v20 = vld [vmem:[%s1572_s1 + $0xa0] sm:$0xff] }
   0x8   :  { %v27_v21 = vld [vmem:[%s1572_s1 + $0x48] sm:$0xff]  ;;  %v28_v23 = vld [vmem:[%s1572_s1 + $0x50] sm:$0xff]  ;;  %v29_v25 = vld [vmem:[%s1572_s1 + $0x58] sm:$0xff] }
   0x9   :  { %v39_v22 = vld [vmem:[%s1572_s1 + $0xa8] sm:$0xff]  ;;  %v40_v24 = vld [vmem:[%s1572_s1 + $0xb0] sm:$0xff]  ;;  %v41_v26 = vld [vmem:[%s1572_s1 + $0xb8] sm:$0xff]  ;;  %s1461_s1 = smov 0  }
   0xc   :  { %1102 = vmatmul.mubr.msk.f32.vlgmr.msra.gmra.mrb[0].mxu0 %vm44_vm0, %v19_v5 }
   0xd   :  { %1120 = vmatmul.mubr.msk.f32.vlgmr.msra.gmra.mrb[0].mxu1 %vm44_vm0, %v31_v6  ;;  %1104 = vmatprep.mubr.msk.f32.mxu0 %vm44_vm0, %v20_v7 }
   0xe   :  { %1122 = vmatprep.mubr.msk.f32.mxu1 %vm44_vm0, %v32_v8 }
  0x10   :  { %1105 = vmatmul.mubr.msk.f32.gmra.mrb[2].mxu0 %vm44_vm0, %v21_v9 }
  0x11   :  { %1123 = vmatmul.mubr.msk.f32.gmra.mrb[2].mxu1 %vm44_vm0, %v33_v10  ;;  %1107 = vmatprep.mubr.msk.f32.mxu0 %vm44_vm0, %v22_v11 }
  0x12   :  { %1125 = vmatprep.mubr.msk.f32.mxu1 %vm44_vm0, %v34_v12 }
  0x14   :  { %1108 = vmatmul.mubr.msk.f32.gmra.mrb[4].mxu0 %vm44_vm0, %v23_v13 }
  0x15   :  { %1126 = vmatmul.mubr.msk.f32.gmra.mrb[4].mxu1 %vm44_vm0, %v35_v14  ;;  %1110 = vmatprep.mubr.msk.f32.mxu0 %vm44_vm0, %v24_v15 }
  0x16   :  { %1128 = vmatprep.mubr.msk.f32.mxu1 %vm44_vm0, %v36_v16 }
  0x18   :  { %1111 = vmatmul.mubr.msk.f32.gmra.mrb[6].mxu0 %vm44_vm0, %v25_v17 }
  0x19   :  { %1129 = vmatmul.mubr.msk.f32.gmra.mrb[6].mxu1 %vm44_vm0, %v37_v18  ;;  %1113 = vmatprep.mubr.msk.f32.mxu0 %vm44_vm0, %v26_v19 }
  0x1a   :  { %1131 = vmatprep.mubr.msk.f32.mxu1 %vm44_vm0, %v38_v20 }
  0x1c   :  { %1114 = vmatmul.mubr.msk.f32.gmra.mrb[8].mxu0 %vm44_vm0, %v27_v21 }
  0x1d   :  { %1132 = vmatmul.mubr.msk.f32.gmra.mrb[8].mxu1 %vm44_vm0, %v39_v22  ;;  %1116 = vmatprep.mubr.msk.f32.mxu0 %vm44_vm0, %v28_v23 }
  0x1e   :  { %1134 = vmatprep.mubr.msk.f32.mxu1 %vm44_vm0, %v40_v24 }
  0x20   :  { %1117 = vmatmul.mubr.msk.f32.gmra.mrb[10].mxu0 %vm44_vm0, %v29_v25 }
  0x21   :  { %1135 = vmatmul.mubr.msk.f32.gmra.mrb[10].mxu1 %vm44_vm0, %v41_v26 }
  0xdf   :  { %v1103_v30 = vpop.f32.mrb[0].mxu0 }
  0xe0   :  { %v1121_v31 = vpop.f32.mrb[0].mxu1  ;;  %310 = vst.msk [vmem:[#allocation2 + $0x8] sm:$0xff] %vm308_vm3, %v1103_v30  ;;  %v189_v32 = vpop.f32.mrb[1].mxu0 }
  0xe1   :  { %322 = vst.msk [vmem:[#allocation2 + $0x68] sm:$0xff] %vm308_vm3, %v1121_v31  ;;  %v249_v33 = vpop.f32.mrb[1].mxu1  ;;  %309 = vst.msk [vmem:[#allocation2] sm:$0xff] %vm308_vm3, %v189_v32 }
  0xe2   :  { %321 = vst.msk [vmem:[#allocation2 + $0x60] sm:$0xff] %vm308_vm3, %v249_v33 }
  0xe3   :  { %v1106_v34 = vpop.f32.mrb[2].mxu0 }
  0xe4   :  { %v1124_v35 = vpop.f32.mrb[2].mxu1  ;;  %312 = vst.msk [vmem:[#allocation2 + $0x18] sm:$0xff] %vm308_vm3, %v1106_v34  ;;  %v199_v36 = vpop.f32.mrb[3].mxu0 }
  0xe5   :  { %324 = vst.msk [vmem:[#allocation2 + $0x78] sm:$0xff] %vm308_vm3, %v1124_v35  ;;  %v259_v37 = vpop.f32.mrb[3].mxu1  ;;  %311 = vst.msk [vmem:[#allocation2 + $0x10] sm:$0xff] %vm308_vm3, %v199_v36 }
  0xe6   :  { %323 = vst.msk [vmem:[#allocation2 + $0x70] sm:$0xff] %vm308_vm3, %v259_v37 }
  0xe7   :  { %v1109_v38 = vpop.f32.mrb[4].mxu0 }
  0xe8   :  { %v1127_v39 = vpop.f32.mrb[4].mxu1  ;;  %314 = vst.msk [vmem:[#allocation2 + $0x28] sm:$0xff] %vm308_vm3, %v1109_v38  ;;  %v209_v40 = vpop.f32.mrb[5].mxu0 }
  0xe9   :  { %326 = vst.msk [vmem:[#allocation2 + $0x88] sm:$0xff] %vm308_vm3, %v1127_v39  ;;  %v269_v41 = vpop.f32.mrb[5].mxu1  ;;  %313 = vst.msk [vmem:[#allocation2 + $0x20] sm:$0xff] %vm308_vm3, %v209_v40 }
  0xea   :  { %325 = vst.msk [vmem:[#allocation2 + $0x80] sm:$0xff] %vm308_vm3, %v269_v41 }
  0xeb   :  { %v1112_v42 = vpop.f32.mrb[6].mxu0 }
  0xec   :  { %v1130_v43 = vpop.f32.mrb[6].mxu1  ;;  %316 = vst.msk [vmem:[#allocation2 + $0x38] sm:$0xff] %vm308_vm3, %v1112_v42  ;;  %v219_v44 = vpop.f32.mrb[7].mxu0 }
  0xed   :  { %328 = vst.msk [vmem:[#allocation2 + $0x98] sm:$0xff] %vm308_vm3, %v1130_v43  ;;  %v279_v45 = vpop.f32.mrb[7].mxu1  ;;  %315 = vst.msk [vmem:[#allocation2 + $0x30] sm:$0xff] %vm308_vm3, %v219_v44 }
  0xee   :  { %327 = vst.msk [vmem:[#allocation2 + $0x90] sm:$0xff] %vm308_vm3, %v279_v45 }
  0xef   :  { %v1115_v46 = vpop.f32.mrb[8].mxu0 }
  0xf0   :  { %v1133_v47 = vpop.f32.mrb[8].mxu1  ;;  %318 = vst.msk [vmem:[#allocation2 + $0x48] sm:$0xff] %vm308_vm3, %v1115_v46  ;;  %v229_v48 = vpop.f32.mrb[9].mxu0 }
  0xf1   :  { %330 = vst.msk [vmem:[#allocation2 + $0xa8] sm:$0xff] %vm308_vm3, %v1133_v47  ;;  %v289_v49 = vpop.f32.mrb[9].mxu1  ;;  %317 = vst.msk [vmem:[#allocation2 + $0x40] sm:$0xff] %vm308_vm3, %v229_v48 }
  0xf2   :  { %329 = vst.msk [vmem:[#allocation2 + $0xa0] sm:$0xff] %vm308_vm3, %v289_v49 }
  0xf3   :  { %v1118_v50 = vpop.f32.mrb[10].mxu0 }
  0xf4   :  { %v1136_v51 = vpop.f32.mrb[10].mxu1  ;;  %320 = vst.msk [vmem:[#allocation2 + $0x58] sm:$0xff] %vm308_vm3, %v1118_v50  ;;  %v239_v52 = vpop.f32.mrb[11].mxu0 }
  0xf5   :  { %332 = vst.msk [vmem:[#allocation2 + $0xb8] sm:$0xff] %vm308_vm3, %v1136_v51  ;;  %v299_v53 = vpop.f32.mrb[11].mxu1  ;;  %319 = vst.msk [vmem:[#allocation2 + $0x50] sm:$0xff] %vm308_vm3, %v239_v52 }
  0xf6   :  { %331 = vst.msk [vmem:[#allocation2 + $0xb0] sm:$0xff] %vm308_vm3, %v299_v53 }
  0xf7 LB: > { %v1291_v54 = vmov 0.0|0.0   ;;  %vm1292_vm4 = vmmov 0   ;;  %v1293_v55 = vmov 0.0   ;;  %s1024_s13 = sshll.u32 %s1285_s1, 4  ;;  %vm462_vm5 = vcmask 64512   ;;  %s343_s1 = sadd.s32 1, %s1285_s1   ;;  %s1285_s1 = sphi %s1461_s1, %s343_s1  }
  0xf8   : > { %1186 = vmatprep.subr.bf16.mxu0 %v1291_v54  ;;  %1141 = vmatprep.mubr.msk.f32.mxu0 %vm1292_vm4, %v1293_v55  ;;  %s1469_s14 = scalar_lea.vmem [#allocation2], %s1024_s13  ;;  %s558_s15 = scalar_lea.vmem [#allocation3], %s1024_s13 }
  0xf9   : > { %p340_p0 = scmp.ge.s32.totalorder %s343_s1, 4  }
  0xfa   :  { %s1494_s16 = smov (%p340_p0), 0  }
  0xfd   : > { %v346_v56 = vld [vmem:[%s1469_s14] sm:$0xff]  ;;  %v1027_v58 = vld [vmem:[%s1469_s14 + $0x48] sm:$0xff] }
  0xfe   : > { %v1026_v57 = vld [vmem:[%s1469_s14 + $0x40] sm:$0xff]  ;;  %356 = vxpose.xlu0.b32.start [1/2] (short) (narrow) %v346_v56, 8  ;;  %v347_v59 = vld [vmem:[%s1469_s14 + $0x8] sm:$0xff] }
  0xff   : > { %v1187_v60 = vpack.c.bf16 %v1027_v58, %v1026_v57  ;;  %v1029_v7 = vld [vmem:[%s1469_s14 + $0x80] sm:$0xff]  ;;  %v1030_v11 = vld [vmem:[%s1469_s14 + $0x88] sm:$0xff] }
 0x100   : > { %1146 = vmatprep.mubr.msk.f32.mxu1 %vm462_vm5, %v1029_v7 }
 0x101   : > { %1188 = vmatpush3.bf16.msra.mxu0 %v1187_v60 }
 0x102   : > { %357 = vxpose.xlu0.b32.end [2/2] (short) (narrow) %v347_v59, 8 }
 0x17e   : > { %v372_v61 = vpop.trf.xlu0 }
 0x17f   : > { %1142 = vmatmul.mubr.msk.f32.vlgmr.msra.gmra.mrb[0].mxu0 %vm308_vm3, %v372_v61 }
 0x252   : > { %v457_v62 = vpop.f32.mrb[0].mxu0 }
 0x253   : > { %v461_v63 = vsel %vm337_vm2, -1e+30, %v457_v62  ;;  %v1143_v0 = vpop.f32.mrb[1].mxu0 }
 0x254   : > { %v463_v1 = vsel %vm462_vm5, %v461_v63, -inf }
 0x255   : > { %464 = vmax.xlane.f32.xlu1 %v463_v1 }
 0x2e2   : > { %v465_v2 = vpop.xlane.xlu1 %464 }
 0x2e3   : > { %v466_v3 = vsub.f32 %v461_v63, %v465_v2 }
 0x2e5   : > { %v467_v4 = vmul.f32 1.442695, %v466_v3 }
 0x2e7   : > { %1238 = vpow2.f32 %v467_v4 }
 0x2f1   : > { %v1239_v5 = vpop.eup %1238 }
 0x2f2   : > { %v469_v6 = vsel %vm462_vm5, %v1239_v5, 0.0 }
 0x2f3   : > { %470 = vadd.xlane.f32.xlu1 %v469_v6 }
 0x380   : > { %v471_v8 = vpop.xlane.xlu1 %470 }
 0x381   : > { %1240 = vrcp.f32 %v471_v8 }
 0x38b   : > { %v1241_v9 = vpop.eup %1240 }
 0x38c   : > { %v473_v10 = vmul.f32 %v1241_v9, %v1239_v5 }
 0x38e   : > { %1144 = vmatprep.subr.msk.mxu1 %vm462_vm5, %v473_v10 }
 0x38f   : > { %1145 = vmatpush3.xpose.msk.msra.mxu1 %vm462_vm5, %v473_v10 }
 0x392   : > { %1147 = vmatmul.mubr.msk.f32.vlgmr.msra.gmra.mrb[0].mxu1 %vm462_vm5, %v1030_v11 }
 0x461   :  { %342 = sbr.rel (!%p340_p0) target bundleno = 247 (0xf7), region = 58 }
 0x465   : > { %v1148_v12 = vpop.f32.mrb[0].mxu1 }
 0x466   : > { %560 = vst.msk [vmem:[%s558_s15 + $0x8] sm:$0xff] %vm462_vm5, %v1148_v12  ;;  %v549_v13 = vpop.f32.mrb[1].mxu1 }
 0x467   : > { %559 = vst.msk [vmem:[%s558_s15] sm:$0xff] %vm462_vm5, %v549_v13 }
 0x468 LB: > { %v1294_v14 = vmov 0.0|0.0   ;;  %vm1295_vm6 = vmmov 0   ;;  %v1296_v15 = vmov 0.0   ;;  %s1035_s17 = sshll.u32 %s1289_s16, 4  ;;  %s1297_s19 = smov 120   ;;  %vm810_vm7 = vcmask 130112   ;;  %s1289_s16 = sphi %s1494_s16, %s566_s16  }
 0x469   : > { %1189 = vmatprep.subr.bf16.mxu0 %v1294_v14  ;;  %1153 = vmatprep.mubr.msk.f32.mxu0 %vm1295_vm6, %v1296_v15  ;;  %s1502_s18 = scalar_lea.vmem [#allocation2], %s1035_s17  ;;  %s1298_s20 = smov 8  }
 0x46a   : > { %v569_v16 = vld [vmem:[%s1502_s18] sm:$0xff]  ;;  %v1038_v18 = vld [vmem:[%s1502_s18 + $0x48] sm:$0xff]  ;;  %s809_s21 = scalar_lea.vmem [#allocation3], %s1035_s17  ;;  %s566_s16 = sadd.s32 1, %s1289_s16  }
 0x46b   : > { %v1037_v17 = vld [vmem:[%s1502_s18 + $0x40] sm:$0xff]  ;;  %581 = vrot.lane.b32.xlu0 %v569_v16, %s1297_s19  ;;  %v570_v19 = vld [vmem:[%s1502_s18 + $0x8] sm:$0xff]  ;;  %p563_p1 = scmp.ge.s32.totalorder %s566_s16, 4  }
 0x46c   : > { %v1242_v20 = vpack.i.bf16 %v1038_v18, %v1037_v17  ;;  %v1041_v34 = vld [vmem:[%s1502_s18 + $0x88] sm:$0xff]  ;;  %v1040_v40 = vld [vmem:[%s1502_s18 + $0x80] sm:$0xff]  ;;  %v823_v54 = vld [vmem:[%s1573_s2 + $0x10] sm:$0xff] (%p563_p1)  ;;  %vm868_vm8 = vcmask (%p563_p1), 523264   ;;  %s1299_s12 = smov (%p563_p1), [#allocation4]  }
 0x46d   :  { %v821_v52 = vld [vmem:[%s1573_s2] sm:$0xff] (%p563_p1)  ;;  %v822_v53 = vld [vmem:[%s1573_s2 + $0x8] sm:$0xff] (%p563_p1)  ;;  %v824_v55 = vld [vmem:[%s1573_s2 + $0x18] sm:$0xff] (%p563_p1)  ;;  %s957_s1 = sshll.u32 (%p563_p1), %s1299_s12, 4  ;;  %s958_s1 = int_to_ptr.vmem [resolvable:$true] %s957_s1 }
 0x46e   : > { %1243 = vrot.lane.b32.xlu1 %v1242_v20, %s1297_s19  ;;  %v1192_v56 = vpack.c.bf16 (%p563_p1), %v822_v53, %v821_v52  ;;  %v1196_v28 = vpack.c.bf16 (%p563_p1), %v824_v55, %v823_v54  ;;  %v825_v29 = vld [vmem:[%s1573_s2 + $0x20] sm:$0xff] (%p563_p1)  ;;  %v826_v57 = vld [vmem:[%s1573_s2 + $0x28] sm:$0xff] (%p563_p1)  ;;  %v827_v60 = vld [vmem:[%s1573_s2 + $0x30] sm:$0xff] (%p563_p1)  ;;  %s1251_s13 = scalar_lea.vmem (%p563_p1), %s958_s1, 256  ;;  %p1256_p3 = scmp.lt.s32.totalorder (%p563_p1), %s958_s1, %s958_s1 }
 0x46f   : > { %583 = vrot.lane.b32.xlu0 %v570_v19, %s1297_s19  ;;  %v1200_v59 = vpack.c.bf16 (%p563_p1), %v826_v57, %v825_v29  ;;  %v828_v61 = vld [vmem:[%s1573_s2 + $0x38] sm:$0xff] (%p563_p1)  ;;  %v1046_v6 = vld [vmem:[%s1574_s3] ss:$0 sm:$0xff] (%p563_p1)  ;;  %p1252_p2 = scmp.ne.s32.totalorder (%p563_p1), %s958_s1, %s1251_s13  ;;  %p1257_p4 = scmp.lt.s32.totalorder (%p563_p1), %s1251_s13, %s1251_s13 }
 0x470   :  { %v1204_v63 = vpack.c.bf16 (%p563_p1), %v828_v61, %v827_v60 }
 0x471   :  { %p1258_p5 = por (%p563_p1), %p1257_p4, %p1256_p3 }
 0x473   :  { %p1259_p6 = pnand (%p563_p1), %p1258_p5, %p1252_p2 }
 0x4dd   : > { %v582_v21 = vpop.permute.xlu0 %581 }
 0x4de   : > { %587 = vxpose.xlu1.b32.start [1/2] (short) (narrow) %v582_v21, 8 }
 0x4e0   : > { %v1244_v22 = vpop.permute.xlu1 %1243 }
 0x4e1   : > { %v584_v23 = vpop.permute.xlu0 %583  ;;  %v1246_v24 = vunpack.i.h.bf16 %v1244_v22  ;;  %v1245_v25 = vunpack.i.l.bf16 %v1244_v22 }
 0x4e2   : > { %588 = vxpose.xlu1.b32.end [2/2] (short) (narrow) %v584_v23, 8 }
 0x4e3   : > { %v1190_v26 = vpack.c.bf16 %v1246_v24, %v1245_v25 }
 0x4e5   : > { %1191 = vmatpush3.bf16.msra.mxu0 %v1190_v26 }
 0x4e6   :  { %1193 = vmatprep.subr.bf16.mxu0 (%p563_p1), %v1192_v56 }
 0x500   : > { %717 = vrot.lane.b32.xlu1 %v1041_v34, %s1297_s19 }
 0x55e   : > { %v603_v27 = vpop.trf.xlu1 }
 0x55f   : > { %1154 = vmatmul.mubr.msk.f32.vlgmr.msra.gmra.mrb[0].mxu0 %vm308_vm3, %v603_v27 }
 0x560   :  { %1195 = vmatpush3.bf16.msra.mxu0 (%p563_p1), %v1192_v56 }
 0x561   :  { %1197 = vmatprep.subr.bf16.mxu0 (%p563_p1), %v1196_v28 }
 0x564   :  { %1199 = vmatpush3.bf16.msra.mxu0 (%p563_p1), %v1196_v28 }
 0x565   :  { %1201 = vmatprep.subr.bf16.mxu0 (%p563_p1), %v1200_v59 }
 0x568   :  { %1203 = vmatpush3.bf16.msra.mxu0 (%p563_p1), %v1200_v59 }
 0x569   :  { %1205 = vmatprep.subr.bf16.mxu0 (%p563_p1), %v1204_v63 }
 0x56c   :  { %1207 = vmatpush3.bf16.msra.mxu0 (%p563_p1), %v1204_v63 }
 0x572   : > { %v718_v45 = vpop.permute.xlu1 %717 }
 0x632   : > { %v696_v30 = vpop.f32.mrb[0].mxu0 }
 0x633   : > { %v700_v31 = vsel %vm337_vm2, -1e+30, %v696_v30  ;;  %v1155_v32 = vpop.f32.mrb[1].mxu0 }
 0x634   : > { %v702_v33 = vsel %vm462_vm5, %v700_v31, -inf }
 0x635   : > { %703 = vmax.xlane.f32.xlu0 %v702_v33 }
 0x6c2   : > { %v704_v35 = vpop.xlane.xlu0 %703 }
 0x6c3   : > { %v705_v36 = vsub.f32 %v700_v31, %v704_v35 }
 0x6c5   : > { %v706_v37 = vmul.f32 1.442695, %v705_v36 }
 0x6c7   : > { %1247 = vpow2.f32 %v706_v37 }
 0x6d1   : > { %v1248_v38 = vpop.eup %1247 }
 0x6d2   : > { %v708_v39 = vsel %vm462_vm5, %v1248_v38, 0.0 }
 0x6d3   : > { %709 = vadd.xlane.f32.xlu0 %v708_v39 }
 0x6e9   : > { %715 = vrot.lane.b32.xlu0 %v1040_v40, %s1297_s19 }
 0x760   : > { %v710_v41 = vpop.xlane.xlu0 %709 }
 0x761   : > { %1249 = vrcp.f32 %v710_v41 }
 0x764   : > { %v716_v42 = vpop.permute.xlu0 %715 }
 0x765   : > { %1158 = vmatprep.mubr.msk.f32.mxu1 %vm462_vm5, %v716_v42 }
 0x76b   : > { %v1250_v43 = vpop.eup %1249 }
 0x76c   : > { %v712_v44 = vmul.f32 %v1250_v43, %v1248_v38 }
 0x76e   : > { %1156 = vmatprep.subr.msk.mxu1 %vm462_vm5, %v712_v44 }
 0x76f   : > { %1157 = vmatpush3.xpose.msk.msra.mxu1 %vm462_vm5, %v712_v44 }
 0x772   : > { %1159 = vmatmul.mubr.msk.f32.vlgmr.msra.gmra.mrb[0].mxu1 %vm462_vm5, %v718_v45 }
 0x845   : > { %v1160_v46 = vpop.f32.mrb[0].mxu1 }
 0x846   : > { %v792_v47 = vpop.f32.mrb[1].mxu1 }
 0x847   : > { %803 = vrot.lane.b32.xlu0 %v792_v47, %s1298_s20 }
 0x84b   : > { %805 = vrot.lane.b32.xlu0 %v1160_v46, %s1298_s20 }
 0x8b8   :  { %565 = sbr.rel (!%p563_p1) target bundleno = 1128 (0x468), region = 69 }
 0x8b9   : > { %v804_v48 = vpop.permute.xlu0 %803 }
 0x8ba   : > { %811 = vst.msk [vmem:[%s809_s21] sm:$0xff] %vm810_vm7, %v804_v48 }
 0x8bd   : > { %v806_v49 = vpop.permute.xlu0 %805 }
 0x8be   : > { %812 = vst.msk [vmem:[%s809_s21 + $0x8] sm:$0xff] %vm810_vm7, %v806_v49 }
 0x8c5   :  { %v813_v50 = vld [vmem:[#allocation3] sm:$0xff]  ;;  %v814_v51 = vld [vmem:[#allocation3 + $0x8] sm:$0xff]  ;;  %v815_v58 = vld [vmem:[#allocation3 + $0x10] sm:$0xff] }
 0x8c6   :  { %836 = vxpose.xlu0.b32.start [1/8] (short) (narrow) %v813_v50, 16  ;;  %v816_v62 = vld [vmem:[#allocation3 + $0x18] sm:$0xff]  ;;  %v817_v0 = vld [vmem:[#allocation3 + $0x20] sm:$0xff]  ;;  %v818_v1 = vld [vmem:[#allocation3 + $0x28] sm:$0xff] }
 0x8c7   :  { %v819_v2 = vld [vmem:[#allocation3 + $0x30] sm:$0xff]  ;;  %v820_v3 = vld [vmem:[#allocation3 + $0x38] sm:$0xff] }
 0x8ca   :  { %837 = vxpose.xlu0.b32.cont [2/8] (short) (narrow) %v814_v51, 16 }
 0x8ce   :  { %838 = vxpose.xlu0.b32.cont [3/8] (short) (narrow) %v815_v58, 16 }
 0x8d2   :  { %839 = vxpose.xlu0.b32.cont [4/8] (short) (narrow) %v816_v62, 16 }
 0x8d6   :  { %840 = vxpose.xlu0.b32.cont [5/8] (short) (narrow) %v817_v0, 16 }
 0x8da   :  { %841 = vxpose.xlu0.b32.cont [6/8] (short) (narrow) %v818_v1, 16 }
 0x8de   :  { %842 = vxpose.xlu0.b32.cont [7/8] (short) (narrow) %v819_v2, 16 }
 0x8e2   :  { %843 = vxpose.xlu0.b32.end [8/8] (short) (narrow) %v820_v3, 16 }
 0x946   :  { %v852_v4 = vpop.trf.xlu0 }
 0x947   :  { %1177 = vmatprep.mubr.msk.f32.mxu0 %vm868_vm8, %v852_v4 }
 0x94a   :  { %v853_v5 = vpop.trf.xlu0 }
 0x94b   :  { %1178 = vmatmul.mubr.msk.f32.vlgmr.msra.gmra.mrb[0].mxu0 %vm868_vm8, %v853_v5 }
 0xa1e   :  { %v1179_v7 = vpop.f32.mrb[0].mxu0 }
 0xa1f   :  { %v947_v8 = vadd.f32 %v1179_v7, %v1046_v6  ;;  %v941_v9 = vpop.f32.mrb[1].mxu0 }
 0xa20   :  { %v942_v10 = vadd.f32 %v1046_v6, %v941_v9 }
 0xa21   :  { %951 = vst.msk [vmem:[#allocation4 + $0x8] sm:$0xff] %vm44_vm0, %v947_v8 }
 0xa22   :  { %950 = vst.msk [vmem:[#allocation4] sm:$0xff] %vm44_vm0, %v942_v10 }
 0xa23   :  { %1262 = shalt.err (!%p1259_p6)
}
 0xa24   :  { %s1263_s15 = scalar_lea.hbm %s1575_s4, 256 }
 0xa25   :  { %p1264_p7 = scmp.ne.s32.totalorder %s1575_s4, %s1263_s15  ;;  %p1267_p8 = scmp.lt.u32.totalorder %s1263_s15, %s1575_s4 }
 0xa27   :  { %p1269_p9 = pnand %p1267_p8, %p1264_p7 }
 0xa29   :  { %1272 = shalt.err (!%p1269_p9)
}
 0xa2a   :  { %s1300_s20 = smov 128   ;;  %s1301_s21 = smov 8  }
 0xa2b   :  { %963 = dma.vmem_to_hbm [thread:$0]  %s958_s1, 256, %s1575_s4, [#allocation5], %s1300_s20, %s1300_s20, %s1301_s21  }
 0xa2c   :  { %1281 = dma.done.wait [#allocation5], 256  }
 0xa2d   :  { %1282 = vsyncadd [#allocation5], 4294967040 }
 0xa2e   :  { %967 = vsyncpa [#allocation5], 1 }

</bundles_post_ra>
